<compile_context>
chip_gen: v7x
topology: tpu7x:2x2x1
jax: 0.10.0
libtpu: 0.0.40
codegen_flags: <defaults>
</compile_context>

<pallas_src>
import functools

import jax
import jax.numpy as jnp
from jax.experimental import pallas as pl
from jax.experimental.pallas import tpu as pltpu

EMBED = 300  # nn.Embedding(input_size, 300)


def _round_up(x, m):
    return ((x + m - 1) // m) * m


# ---------------------------------------------------------------------------
# Kernel 1: hoisted input projection for both GRU directions (one big matmul)
# ---------------------------------------------------------------------------
def proj_kernel(x_ref, w_ref, b_ref, out_ref):
    # x_ref: (RT, Ep) bf16, w_ref: (Ep, Gp) bf16, b_ref: (1, Gp) f32
    acc = jnp.dot(x_ref[...], w_ref[...], preferred_element_type=jnp.float32)
    out_ref[...] = (acc + b_ref[...]).astype(out_ref.dtype)       # bf16 gi


# ---------------------------------------------------------------------------
# Kernel 2: bidirectional GRU recurrence + fused final FC + sigmoid
#   gi_f_ref / gi_b_ref : (TT, BC, PD) bf16  (forward / time-reversed streams)
#   whh_ref             : (2H, 6H)  bf16 block-diagonal [Whh_f | 0 ; 0 | Whh_b]
#   bhh_ref             : (1, 6H)   f32   [bhh_f | bhh_b]
#   wfc_ref / bfc_ref   : (1, 2H) / (1, 1) f32
#   h2_ref (scratch)    : (BC, 2H)  f32   [h_f | h_b]
# ---------------------------------------------------------------------------
def gru_recurrence_kernel(gi_f_ref, gi_b_ref, whh_ref, bhh_ref,
                          wfc_ref, bfc_ref, out_ref, h2_ref, *, hidden, tt):
    H = hidden
    t = pl.program_id(1)
    n_t = pl.num_programs(1)

    @pl.when(t == 0)
    def _init():
        h2_ref[...] = jnp.zeros_like(h2_ref)

    whh = whh_ref[...]                      # (2H, 6H) bf16, resident
    bhh = bhh_ref[...]                      # (1, 6H)  f32
    h2 = h2_ref[...]                        # (BC, 2H) f32

    def gates(gi, gh_d, h_d):
        # PyTorch GRU cell, gate order (r, z, n); gates packed contiguously.
        i_r, i_z, i_n = gi[:, 0:H], gi[:, H:2 * H], gi[:, 2 * H:3 * H]
        h_r, h_z, h_n = gh_d[:, 0:H], gh_d[:, H:2 * H], gh_d[:, 2 * H:3 * H]
        r = jax.nn.sigmoid(i_r + h_r)
        z = jax.nn.sigmoid(i_z + h_z)
        n = jnp.tanh(i_n + r * h_n)
        return (1.0 - z) * n + z * h_d

    # Static (compile-time) unrolled loop over the TT timesteps of this block.
    for s in range(tt):
        gi_f = gi_f_ref[s].astype(jnp.float32)             # (BC, PD)
        gi_b = gi_b_ref[tt - 1 - s].astype(jnp.float32)    # reversed in-block
        # One fused block-diagonal hidden matmul for both directions.
        gh = (jnp.dot(h2.astype(jnp.bfloat16), whh,
                      preferred_element_type=jnp.float32) + bhh)   # (BC, 6H)
        h_f = gates(gi_f, gh[:, 0:3 * H], h2[:, 0:H])
        h_b = gates(gi_b, gh[:, 3 * H:6 * H], h2[:, H:2 * H])
        h2 = jnp.concatenate([h_f, h_b], axis=-1)          # (BC, 2H)

    h2_ref[...] = h2

    @pl.when(t == n_t - 1)
    def _finalize():
        # fc1: Linear(2H, 1) + Sigmoid as a VPU multiply + lane reduction
        # (no concat copy, no N=1 MXU matmul).
        logit = (jnp.sum(h2 * wfc_ref[...], axis=-1, keepdims=True)
                 + bfc_ref[...])                            # (BC, 1)
        out_ref[...] = jax.nn.sigmoid(logit)


# ---------------------------------------------------------------------------
# Parameter packing
#   W_ih : (Ep, 2*PD) bf16, per-direction gates contiguous, lane-slot padded
#   W_hh : (2H, 6H)   bf16 block-diagonal
# ---------------------------------------------------------------------------
def _pack_params(params, H, Ep):
    PD = _round_up(3 * H, 128)

    def pack_ih(w):
        # (EMBED, 3H) -> (Ep, PD): gates stay contiguous, pad rows + trailing lanes.
        return jnp.pad(w, ((0, Ep - EMBED), (0, PD - 3 * H)))

    def pack_bih(b):
        return jnp.pad(b, ((0, 0), (0, PD - 3 * H)))        # (1, PD)

    wih = jnp.concatenate([pack_ih(params["wih_f"]),
                           pack_ih(params["wih_b"])], axis=1).astype(jnp.bfloat16)
    bih = jnp.concatenate([pack_bih(params["bih_f"]),
                           pack_bih(params["bih_b"])], axis=1).astype(jnp.float32)

    whh = jnp.zeros((2 * H, 6 * H), jnp.float32)
    whh = whh.at[:H, :3 * H].set(params["whh_f"])
    whh = whh.at[H:, 3 * H:].set(params["whh_b"])

    bhh = jnp.concatenate([params["bhh_f"], params["bhh_b"]], axis=1)  # (1, 6H)

    wfc2 = params["wfc"][:, 0][None, :]                      # (1, 2H) [fwd|bwd]

    return dict(
        wih=wih, bih=bih,
        whh=whh.astype(jnp.bfloat16),
        bhh=bhh.astype(jnp.float32),
        wfc=wfc2.astype(jnp.float32),
        bfc=params["bfc"].astype(jnp.float32),               # (1, 1)
    )


# ---------------------------------------------------------------------------
# Forward pass
# ---------------------------------------------------------------------------
def rnn_forward(tokens, params, hidden_size):
    H = hidden_size
    B, T = tokens.shape
    Ep = _round_up(EMBED, 128)      # contraction-aligned embedding width
    PD = _round_up(3 * H, 128)      # per-direction packed gate width
    Gp = 2 * PD                     # fwd + bwd

    # Batch padding / chunking (BC = per-core batch chunk; "parallel" grid axis
    # lets v7x's two TensorCores split the batch; harmless on v5e/v6e).
    b8 = max(8, _round_up(B, 8))
    BC = min(b8, 64)
    Bp = _round_up(b8, BC)
    n_bc = Bp // BC

    # Time-axis coarsening: TT timesteps per recurrence grid step.
    TT = 1
    for cand in (32, 16, 8, 4, 2):
        if T % cand == 0:
            TT = cand
            break
    nT = T // TT

    p = _pack_params(params, H, Ep)

    # Embedding lookup (plain JAX gather, glue): directly bf16 / time-major,
    # single fused pad -> (T*Bp, Ep) bf16.
    emb = params["embedding"].astype(jnp.bfloat16)
    x = jnp.take(emb, tokens.T, axis=0)                       # (T, B, E) bf16
    x = jnp.pad(x, ((0, 0), (0, Bp - B), (0, Ep - EMBED)))    # (T, Bp, Ep)
    x = x.reshape(T * Bp, Ep)

    # ---- Kernel 1: one big input-projection matmul for both directions ----
    M = T * Bp
    RT = min(M, 2048)   # bf16 output => ~5 MB double-buffered, fits all gens
    gi = pl.pallas_call(
        proj_kernel,
        out_shape=jax.ShapeDtypeStruct((M, Gp), jnp.bfloat16),
        grid_spec=pltpu.PrefetchScalarGridSpec(
            num_scalar_prefetch=0,
            grid=(pl.cdiv(M, RT),),
            in_specs=[
                pl.BlockSpec((RT, Ep), lambda i: (i, 0)),
                pl.BlockSpec((Ep, Gp), lambda i: (0, 0)),
                pl.BlockSpec((1, Gp), lambda i: (0, 0)),
            ],
            out_specs=pl.BlockSpec((RT, Gp), lambda i: (i, 0)),
        ),
        compiler_params=pltpu.CompilerParams(
            dimension_semantics=("parallel",)),
    )(x, p["wih"], p["bih"])

    gi = gi.reshape(T, Bp, Gp)

    # ---- Kernel 2: recurrence (grid over batch chunks x coarse time) ----
    out = pl.pallas_call(
        functools.partial(gru_recurrence_kernel, hidden=H, tt=TT),
        out_shape=jax.ShapeDtypeStruct((Bp, 1), jnp.float32),
        grid_spec=pltpu.PrefetchScalarGridSpec(
            num_scalar_prefetch=0,
            grid=(n_bc, nT),
            in_specs=[
                # forward stream: gi[t-block, b-chunk, fwd lane slot]
                pl.BlockSpec((TT, BC, PD), lambda b, t: (t, b, 0)),
                # backward stream: gi[nT-1-t, b-chunk, bwd lane slot]
                pl.BlockSpec((TT, BC, PD), lambda b, t: (nT - 1 - t, b, 1)),
                # resident weights / biases
                pl.BlockSpec((2 * H, 6 * H), lambda b, t: (0, 0)),
                pl.BlockSpec((1, 6 * H), lambda b, t: (0, 0)),
                pl.BlockSpec((1, 2 * H), lambda b, t: (0, 0)),
                pl.BlockSpec((1, 1), lambda b, t: (0, 0)),
            ],
            out_specs=pl.BlockSpec((BC, 1), lambda b, t: (b, 0)),
            scratch_shapes=[pltpu.VMEM((BC, 2 * H), jnp.float32)],  # [h_f|h_b]
        ),
        compiler_params=pltpu.CompilerParams(
            dimension_semantics=("parallel", "arbitrary")),
    )(gi, gi, p["whh"], p["bhh"], p["wfc"], p["bfc"])

    return out[:B, 0]   # label.squeeze() -> (B,)


# ---------------------------------------------------------------------------
# Parameter init (logical PyTorch-like shapes; packing/padding done above)
# ---------------------------------------------------------------------------
def init_params(key, vocab_size, hidden_size):
    H = hidden_size
    ks = jax.random.split(key, 11)
    gru_bound = 1.0 / jnp.sqrt(jnp.float32(H))       # PyTorch GRU init range
    fc_bound = 1.0 / jnp.sqrt(jnp.float32(2 * H))    # PyTorch Linear init range

    def u(k, shape, bound):
        return jax.random.uniform(k, shape, jnp.float32, -bound, bound)

    return dict(
        embedding=jax.random.normal(ks[0], (vocab_size, EMBED), jnp.float32),
        # forward direction (stored transposed: (in, 3H), gate order r,z,n)
        wih_f=u(ks[1], (EMBED, 3 * H), gru_bound),
        whh_f=u(ks[2], (H, 3 * H), gru_bound),
        bih_f=u(ks[3], (1, 3 * H), gru_bound),
        bhh_f=u(ks[4], (1, 3 * H), gru_bound),
        # reverse direction
        wih_b=u(ks[5], (EMBED, 3 * H), gru_bound),
        whh_b=u(ks[6], (H, 3 * H), gru_bound),
        bih_b=u(ks[7], (1, 3 * H), gru_bound),
        bhh_b=u(ks[8], (1, 3 * H), gru_bound),
        # fc1 linear: (2H, 1)
        wfc=u(ks[9], (2 * H, 1), fc_bound),
        bfc=u(ks[10], (1, 1), fc_bound),
    )


if __name__ == "__main__":
    VOCAB = 50        # input_size
    HIDDEN = 32       # hidden_size
    BATCH = 2
    SEQ = 8

    key = jax.random.PRNGKey(0)
    k_params, k_tokens = jax.random.split(key)
    params = init_params(k_params, VOCAB, HIDDEN)
    tokens = jax.random.randint(k_tokens, (BATCH, SEQ), 0, VOCAB, dtype=jnp.int32)

    label = rnn_forward(tokens, params, HIDDEN)
    jax.block_until_ready(label)
    assert label.shape == (BATCH,)
    assert bool(jnp.all(jnp.isfinite(label)))
    assert bool(jnp.all((label > 0.0) & (label < 1.0)))
    print("KERNEL_OK")
</pallas_src>

<mosaic_0001>
module attributes {stable_mosaic.version = 11 : i64} {
  func.func @proj_kernel(%arg0: i32, %arg1: memref<64x384xbf16, #tpu.memory_space<vmem>>, %arg2: memref<384x256xbf16, #tpu.memory_space<vmem>>, %arg3: memref<1x256xf32, #tpu.memory_space<vmem>>, %arg4: memref<64x256xbf16, #tpu.memory_space<vmem>>) attributes {dimension_semantics = [#tpu.dimension_semantics<parallel>], iteration_bounds = array<i64: 1>, scalar_prefetch = 0 : i64, scratch_operands = 0 : i64, tpu.core_type = #tpu.core_type<tc>, window_params = [{transform_indices = @transform_0, window_bounds = array<i64: 64, 384>}, {pipeline_mode = #tpu.pipeline_mode<synchronous>, transform_indices = @transform_1, window_bounds = array<i64: 384, 256>}, {pipeline_mode = #tpu.pipeline_mode<synchronous>, transform_indices = @transform_2, window_bounds = array<i64: 1, 256>}, {transform_indices = @transform_3, window_bounds = array<i64: 64, 256>}]} {
    %c0 = arith.constant 0 : index
    %c0_0 = arith.constant 0 : index
    %0 = vector.load %arg1[%c0, %c0_0] : memref<64x384xbf16, #tpu.memory_space<vmem>>, vector<64x384xbf16>
    %c0_1 = arith.constant 0 : index
    %c0_2 = arith.constant 0 : index
    %1 = vector.load %arg2[%c0_1, %c0_2] : memref<384x256xbf16, #tpu.memory_space<vmem>>, vector<384x256xbf16>
    %cst = arith.constant dense<0.000000e+00> : vector<64x256xf32>
    %2 = tpu.matmul %0, %1, %cst {dimension_numbers = #tpu.dot_dimension_numbers<[1], [0], [0], [1], [0, 0, 1, 1], [], []>} : vector<64x384xbf16>, vector<384x256xbf16>, vector<64x256xf32> -> vector<64x256xf32>
    %c0_3 = arith.constant 0 : index
    %c0_4 = arith.constant 0 : index
    %3 = vector.load %arg3[%c0_3, %c0_4] : memref<1x256xf32, #tpu.memory_space<vmem>>, vector<1x256xf32>
    %4 = vector.broadcast %3 : vector<1x256xf32> to vector<64x256xf32>
    %5 = arith.addf %2, %4 : vector<64x256xf32>
    %6 = arith.truncf %5 : vector<64x256xf32> to vector<64x256xbf16>
    %c0_5 = arith.constant 0 : index
    %c0_6 = arith.constant 0 : index
    %7 = vector.load %arg4[%c0_5, %c0_6] : memref<64x256xbf16, #tpu.memory_space<vmem>>, vector<64x256xbf16>
    tpu.vector_store %arg4[%c0_5, %c0_6], %6 {strides = array<i32>} : memref<64x256xbf16, #tpu.memory_space<vmem>>, vector<64x256xbf16>,
    return
  }
  func.func @transform_0(%arg0: i32) -> (i32, i32) {
    %c0_i32 = arith.constant 0 : i32
    %c0_i32_0 = arith.constant 0 : i32
    return %arg0, %c0_i32 : i32, i32
  }
  func.func @transform_1(%arg0: i32) -> (i32, i32) {
    %c0_i32 = arith.constant 0 : i32
    %c0_i32_0 = arith.constant 0 : i32
    %c0_i32_1 = arith.constant 0 : i32
    return %c0_i32, %c0_i32_0 : i32, i32
  }
  func.func @transform_2(%arg0: i32) -> (i32, i32) {
    %c0_i32 = arith.constant 0 : i32
    %c0_i32_0 = arith.constant 0 : i32
    %c0_i32_1 = arith.constant 0 : i32
    return %c0_i32, %c0_i32_0 : i32, i32
  }
  func.func @transform_3(%arg0: i32) -> (i32, i32) {
    %c0_i32 = arith.constant 0 : i32
    %c0_i32_0 = arith.constant 0 : i32
    return %arg0, %c0_i32 : i32, i32
  }
}

</mosaic_0001>

<bundles_post_ra>
// kernel: tpu_custom_call.1
= control target key start
LH: loop header
LB: loop body
LE: loop exit
PB: predicated region body
PF: predicated region fallthrough
CT: control target
= control target key end

     0   :  { %8 = vsyncpa [#allocation3], 0  ;;  %s1007_s0 = inlined_call_operand.hbm [shape: bf16[64,384], index: 0, kind: input, shape index: {}]   ;;  %s1008_s1 = inlined_call_operand.hbm [shape: bf16[384,256], index: 1, kind: input, shape index: {}]   ;;  %s1009_s2 = inlined_call_operand.vmem [shape: f32[1,256], index: 2, kind: input, shape index: {}]   ;;  %s1010_s3 = inlined_call_operand.hbm [shape: bf16[64,256], index: 3, kind: output, shape index: {}]  }
   0x1   :  { %9 = vsyncpa [#allocation6], 0 }
   0x2   :  { %10 = vsyncpa [#allocation4], 0  ;;  %s920_s12 = smov [#allocation2]   ;;  %s848_s16 = scalar_lea.hbm %s1007_s0, 1536 }
   0x3   :  { %s16_s13 = sshll.u32 %s920_s12, 4  ;;  %p849_p0 = scmp.ne.s32.totalorder %s1007_s0, %s848_s16  ;;  %s17_s13 = int_to_ptr.vmem [resolvable:$true] %s16_s13 }
   0x4   :  { %p852_p1 = scmp.lt.u32.totalorder %s848_s16, %s1007_s0 }
   0x6   :  { %p854_p2 = pnand %p852_p1, %p849_p0 }
   0x8   :  { %857 = shalt.err (!%p854_p2)
}
   0x9   :  { %s858_s21 = scalar_lea.vmem %s17_s13, 1536  ;;  %p863_p4 = scmp.lt.s32.totalorder %s17_s13, %s17_s13 }
   0xa   :  { %p859_p3 = scmp.ne.s32.totalorder %s17_s13, %s858_s21  ;;  %p864_p5 = scmp.lt.s32.totalorder %s858_s21, %s858_s21 }
   0xc   :  { %p865_p6 = por %p864_p5, %p863_p4 }
   0xe   :  { %p866_p7 = pnand %p865_p6, %p859_p3 }
  0x10   :  { %869 = shalt.err (!%p866_p7)
}
  0x11   :  { %s921_s22 = smov 192   ;;  %s922_s23 = smov 12  }
  0x12   :  { %22 = dma.hbm_to_vmem [thread:$0]  %s1007_s0, 1536, %s17_s13, [#allocation3], %s921_s22, %s921_s22, %s922_s23  }
  0x13   :  { %s923_s26 = smov [#allocation5]   ;;  %s870_s30 = scalar_lea.hbm %s1008_s1, 6144 }
  0x14   :  { %s28_s27 = sshll.u32 %s923_s26, 4  ;;  %p871_p8 = scmp.ne.s32.totalorder %s1008_s1, %s870_s30  ;;  %s29_s27 = int_to_ptr.vmem [resolvable:$true] %s28_s27 }
  0x15   :  { %p874_p9 = scmp.lt.u32.totalorder %s870_s30, %s1008_s1 }
  0x17   :  { %p876_p10 = pnand %p874_p9, %p871_p8 }
  0x19   :  { %879 = shalt.err (!%p876_p10)
}
  0x1a   :  { %s880_s8 = scalar_lea.vmem %s29_s27, 6144  ;;  %p885_p12 = scmp.lt.s32.totalorder %s29_s27, %s29_s27 }
  0x1b   :  { %p881_p11 = scmp.ne.s32.totalorder %s29_s27, %s880_s8  ;;  %p886_p13 = scmp.lt.s32.totalorder %s880_s8, %s880_s8 }
  0x1d   :  { %p887_p0 = por %p886_p13, %p885_p12 }
  0x1f   :  { %p888_p1 = pnand %p887_p0, %p881_p11 }
  0x21   :  { %891 = shalt.err (!%p888_p1)
}
  0x22   :  { %s924_s0 = smov 128   ;;  %s925_s9 = smov 8  }
  0x23   :  { %34 = dma.hbm_to_vmem [thread:$0]  %s1008_s1, 6144, %s29_s27, [#allocation6], %s924_s0, %s924_s0, %s925_s9  }
  0x24   :  { %914 = dma.done.wait [#allocation3], 1536  }
  0x25   :  { %915 = vsyncadd [#allocation3], 4294965760 }
  0x26   :  { %916 = dma.done.wait [#allocation6], 6144  }
  0x27   :  { %917 = vsyncadd [#allocation6], 4294961152  ;;  %v926_v0 = vmov 0   ;;  %v760_v1 = vld [vmem:[#allocation5 + $0x4] ss:$8 sps:$4 sm:$0xff]  }
  0x28   :  { %529 = vmatprep.mubr.bf16.mxu0 %v926_v0  ;;  %v762_v2 = vld [vmem:[#allocation5] ss:$8 sps:$4 sm:$0xff]   ;;  %424 = vmatprep.subr.bf16.mxu1 %v760_v1  ;;  %v763_v3 = vld [vmem:[#allocation5 + $0x14] ss:$8 sps:$4 sm:$0xff]   ;;  %v765_v4 = vld [vmem:[#allocation5 + $0x10] ss:$8 sps:$4 sm:$0xff]   ;;  %v110_v1 = vlaneseq }
  0x29   :  { %425 = vmatpush1.bf16.msra.mxu1 %v762_v2  ;;  %v766_v5 = vld [vmem:[#allocation5 + $0x24] ss:$8 sps:$4 sm:$0xff]   ;;  %v768_v6 = vld [vmem:[#allocation5 + $0x20] ss:$8 sps:$4 sm:$0xff]   ;;  %v769_v7 = vld [vmem:[#allocation5 + $0x34] ss:$8 sps:$4 sm:$0xff]  }
  0x2a   :  { %426 = vmatprep.subr.bf16.mxu1 %v763_v3  ;;  %v771_v8 = vld [vmem:[#allocation5 + $0x30] ss:$8 sps:$4 sm:$0xff]   ;;  %v784_v9 = vld [vmem:[#allocation5 + $0x104] ss:$8 sps:$4 sm:$0xff]   ;;  %v788_v11 = vld [vmem:[#allocation5 + $0x100] ss:$8 sps:$4 sm:$0xff]  }
  0x2b   :  { %v772_v10 = vld [vmem:[#allocation5 + $0x44] ss:$8 sps:$4 sm:$0xff]   ;;  %497 = vmatprep.subr.bf16.mxu0 %v784_v9  ;;  %v790_v12 = vld [vmem:[#allocation5 + $0x114] ss:$8 sps:$4 sm:$0xff]   ;;  %v774_v13 = vld [vmem:[#allocation5 + $0x40] ss:$8 sps:$4 sm:$0xff]  }
  0x2c   :  { %498 = vmatpush1.bf16.msra.mxu0 %v788_v11  ;;  %v775_v14 = vld [vmem:[#allocation5 + $0x54] ss:$8 sps:$4 sm:$0xff]   ;;  %v794_v15 = vld [vmem:[#allocation5 + $0x110] ss:$8 sps:$4 sm:$0xff]   ;;  %v796_v16 = vld [vmem:[#allocation5 + $0x124] ss:$8 sps:$4 sm:$0xff]  }
  0x2d   :  { %427 = vmatpush1.bf16.msra.mxu1 %v765_v4  ;;  %499 = vmatprep.subr.bf16.mxu0 %v790_v12  ;;  %v777_v17 = vld [vmem:[#allocation5 + $0x50] ss:$8 sps:$4 sm:$0xff]   ;;  %v800_v18 = vld [vmem:[#allocation5 + $0x120] ss:$8 sps:$4 sm:$0xff]   ;;  %v802_v19 = vld [vmem:[#allocation5 + $0x134] ss:$8 sps:$4 sm:$0xff]  }
  0x2e   :  { %428 = vmatprep.subr.bf16.mxu1 %v766_v5  ;;  %v778_v20 = vld [vmem:[#allocation5 + $0x64] ss:$8 sps:$4 sm:$0xff]   ;;  %v806_v21 = vld [vmem:[#allocation5 + $0x130] ss:$8 sps:$4 sm:$0xff]   ;;  %v780_v22 = vld [vmem:[#allocation5 + $0x60] ss:$8 sps:$4 sm:$0xff]  }
  0x2f   :  { %v808_v23 = vld [vmem:[#allocation5 + $0x144] ss:$8 sps:$4 sm:$0xff]   ;;  %v781_v24 = vld [vmem:[#allocation5 + $0x74] ss:$8 sps:$4 sm:$0xff]   ;;  %v783_v25 = vld [vmem:[#allocation5 + $0x70] ss:$8 sps:$4 sm:$0xff]  }
  0x30   :  { %500 = vmatpush1.bf16.msra.mxu0 %v794_v15  ;;  %v812_v26 = vld [vmem:[#allocation5 + $0x140] ss:$8 sps:$4 sm:$0xff]   ;;  %v814_v27 = vld [vmem:[#allocation5 + $0x154] ss:$8 sps:$4 sm:$0xff]   ;;  %v786_v28 = vld [vmem:[#allocation5 + $0x84] ss:$8 sps:$4 sm:$0xff]  }
  0x31   :  { %429 = vmatpush1.bf16.msra.mxu1 %v768_v6  ;;  %501 = vmatprep.subr.bf16.mxu0 %v796_v16  ;;  %v818_v29 = vld [vmem:[#allocation5 + $0x150] ss:$8 sps:$4 sm:$0xff]   ;;  %v789_v30 = vld [vmem:[#allocation5 + $0x80] ss:$8 sps:$4 sm:$0xff]   ;;  %v820_v31 = vld [vmem:[#allocation5 + $0x164] ss:$8 sps:$4 sm:$0xff]  }
  0x32   :  { %430 = vmatprep.subr.bf16.mxu1 %v769_v7  ;;  %v792_v32 = vld [vmem:[#allocation5 + $0x94] ss:$8 sps:$4 sm:$0xff]   ;;  %v795_v33 = vld [vmem:[#allocation5 + $0x90] ss:$8 sps:$4 sm:$0xff]   ;;  %v824_v35 = vld [vmem:[#allocation5 + $0x160] ss:$8 sps:$4 sm:$0xff]  }
  0x33   :  { %v834_v34 = vld [vmem:[#allocation2 + $0x4] ss:$12 sps:$4 sm:$0xff]   ;;  %v826_v36 = vld [vmem:[#allocation5 + $0x174] ss:$8 sps:$4 sm:$0xff]   ;;  %v801_v39 = vld [vmem:[#allocation5 + $0xa0] ss:$8 sps:$4 sm:$0xff]  }
  0x34   :  { %502 = vmatpush1.bf16.msra.mxu0 %v800_v18  ;;  %v798_v37 = vld [vmem:[#allocation5 + $0xa4] ss:$8 sps:$4 sm:$0xff]   ;;  %456 = vmatprep.mubr.bf16.mxu1 %v834_v34  ;;  %v830_v38 = vld [vmem:[#allocation5 + $0x170] ss:$8 sps:$4 sm:$0xff]   ;;  %v804_v40 = vld [vmem:[#allocation5 + $0xb4] ss:$8 sps:$4 sm:$0xff]  }
  0x35   :  { %431 = vmatpush1.bf16.msra.mxu1 %v771_v8  ;;  %503 = vmatprep.subr.bf16.mxu0 %v802_v19  ;;  %v835_v41 = vld [vmem:[#allocation2 + $0x8] ss:$12 sps:$4 sm:$0xff]   ;;  %v807_v42 = vld [vmem:[#allocation5 + $0xb0] ss:$8 sps:$4 sm:$0xff]   ;;  %v810_v43 = vld [vmem:[#allocation5 + $0xc4] ss:$8 sps:$4 sm:$0xff]  }
  0x36   :  { %432 = vmatprep.subr.bf16.mxu1 %v772_v10  ;;  %v813_v44 = vld [vmem:[#allocation5 + $0xc0] ss:$8 sps:$4 sm:$0xff]   ;;  %v816_v45 = vld [vmem:[#allocation5 + $0xd4] ss:$8 sps:$4 sm:$0xff]   ;;  %v819_v47 = vld [vmem:[#allocation5 + $0xd0] ss:$8 sps:$4 sm:$0xff]  }
  0x37   :  { %v838_v46 = vld [vmem:[#allocation2 + $0x20] ss:$12 sps:$4 sm:$0xff]   ;;  %v828_v50 = vld [vmem:[#allocation5 + $0xf4] ss:$8 sps:$4 sm:$0xff]   ;;  %v842_v51 = vld [vmem:[#allocation2 + $0x38] ss:$12 sps:$4 sm:$0xff]  }
  0x38   :  { %504 = vmatpush1.bf16.msra.mxu0 %v806_v21  ;;  %v822_v48 = vld [vmem:[#allocation5 + $0xe4] ss:$8 sps:$4 sm:$0xff]   ;;  %v825_v49 = vld [vmem:[#allocation5 + $0xe0] ss:$8 sps:$4 sm:$0xff]   ;;  %v831_v52 = vld [vmem:[#allocation5 + $0xf0] ss:$8 sps:$4 sm:$0xff]  }
  0x39   :  { %433 = vmatpush1.bf16.msra.mxu1 %v774_v13  ;;  %505 = vmatprep.subr.bf16.mxu0 %v808_v23  ;;  %v832_v53 = vld [vmem:[#allocation2] ss:$12 sps:$4 sm:$0xff]   ;;  %v836_v54 = vld [vmem:[#allocation2 + $0x1c] ss:$12 sps:$4 sm:$0xff]   ;;  %v839_v56 = vld [vmem:[#allocation2 + $0x18] ss:$12 sps:$4 sm:$0xff]  }
  0x3a   :  { %434 = vmatprep.subr.bf16.mxu1 %v775_v14  ;;  %v846_v55 = vld [vmem:[#allocation2 + $0x50] ss:$12 sps:$4 sm:$0xff]   ;;  %v840_v57 = vld [vmem:[#allocation2 + $0x34] ss:$12 sps:$4 sm:$0xff]   ;;  %v844_v59 = vld [vmem:[#allocation2 + $0x4c] ss:$12 sps:$4 sm:$0xff]  }
  0x3b   :  { %v843_v58 = vld [vmem:[#allocation2 + $0x30] ss:$12 sps:$4 sm:$0xff]   ;;  %v847_v60 = vld [vmem:[#allocation2 + $0x48] ss:$12 sps:$4 sm:$0xff]   ;;  %v111_v4 = vshrl.u32 %v110_v1, 7 }
  0x3c   :  { %506 = vmatpush1.bf16.msra.mxu0 %v812_v26  ;;  %v108_v8 = vld [vmem:[%s1009_s2] sm:$0x3]  ;;  %s927_s2 = smov [#allocation7]  }
  0x3d   :  { %435 = vmatpush1.bf16.msra.mxu1 %v777_v17  ;;  %507 = vmatprep.subr.bf16.mxu0 %v814_v27  ;;  %v112_v7 = vsub.s32 0, %v111_v4  ;;  %v116_v9 = vsub.s32 1, %v111_v4  ;;  %s631_s13 = sshll.u32 %s927_s2, 4  ;;  %s632_s13 = int_to_ptr.vmem [resolvable:$true] %s631_s13 }
  0x3e   :  { %436 = vmatprep.subr.bf16.mxu1 %v778_v20  ;;  %s892_s14 = scalar_lea.vmem %s632_s13, 1024  ;;  %p897_p3 = scmp.lt.s32.totalorder %s632_s13, %s632_s13 }
  0x3f   :  { %v113_v12 = vrot.slane %v108_v8, %v112_v7  ;;  %v982_v14 = vrot.slane %v108_v8, %v116_v9  ;;  %p893_p2 = scmp.ne.s32.totalorder %s632_s13, %s892_s14  ;;  %p898_p4 = scmp.lt.s32.totalorder %s892_s14, %s892_s14 }
  0x40   :  { %508 = vmatpush1.bf16.msra.mxu0 %v818_v29 }
  0x41   :  { %437 = vmatpush1.bf16.msra.mxu1 %v780_v22  ;;  %509 = vmatprep.subr.bf16.mxu0 %v820_v31  ;;  %p899_p5 = por %p898_p4, %p897_p3 }
  0x42   :  { %438 = vmatprep.subr.bf16.mxu1 %v781_v24 }
  0x43   :  { %p900_p6 = pnand %p899_p5, %p893_p2 }
  0x44   :  { %510 = vmatpush1.bf16.msra.mxu0 %v824_v35 }
  0x45   :  { %439 = vmatpush1.bf16.msra.mxu1 %v783_v25  ;;  %511 = vmatprep.subr.bf16.mxu0 %v826_v36 }
  0x46   :  { %440 = vmatprep.subr.bf16.mxu1 %v786_v28 }
  0x48   :  { %512 = vmatpush1.bf16.msra.mxu0 %v830_v38 }
  0x49   :  { %441 = vmatpush1.bf16.msra.mxu1 %v789_v30 }
  0x4a   :  { %442 = vmatprep.subr.bf16.mxu1 %v792_v32 }
  0x4b   :  { %530 = vmatmul.mubr.bf16.vlgmr.msra.gmra.mrb[0].mxu0 %v835_v41 }
  0x4c   :  { %539 = vmatprep.mubr.bf16.mxu0 %v926_v0 }
  0x4d   :  { %443 = vmatpush1.bf16.msra.mxu1 %v795_v33 }
  0x4e   :  { %444 = vmatprep.subr.bf16.mxu1 %v798_v37 }
  0x51   :  { %445 = vmatpush1.bf16.msra.mxu1 %v801_v39 }
  0x52   :  { %446 = vmatprep.subr.bf16.mxu1 %v804_v40 }
  0x53   :  { %540 = vmatmul.mubr.bf16.gmra.mrb[4].mxu0 %v838_v46 }
  0x54   :  { %549 = vmatprep.mubr.bf16.mxu0 %v926_v0 }
  0x55   :  { %447 = vmatpush1.bf16.msra.mxu1 %v807_v42 }
  0x56   :  { %448 = vmatprep.subr.bf16.mxu1 %v810_v43 }
  0x59   :  { %449 = vmatpush1.bf16.msra.mxu1 %v813_v44 }
  0x5a   :  { %450 = vmatprep.subr.bf16.mxu1 %v816_v45 }
  0x5b   :  { %550 = vmatmul.mubr.bf16.gmra.mrb[8].mxu0 %v842_v51 }
  0x5c   :  { %559 = vmatprep.mubr.bf16.mxu0 %v926_v0 }
  0x5d   :  { %451 = vmatpush1.bf16.msra.mxu1 %v819_v47 }
  0x5e   :  { %452 = vmatprep.subr.bf16.mxu1 %v822_v48 }
  0x61   :  { %453 = vmatpush1.bf16.msra.mxu1 %v825_v49 }
  0x62   :  { %454 = vmatprep.subr.bf16.mxu1 %v828_v50 }
  0x63   :  { %560 = vmatmul.mubr.bf16.gmra.mrb[12].mxu0 %v846_v55 }
  0x65   :  { %455 = vmatpush1.bf16.msra.mxu1 %v831_v52 }
  0x68   :  { %457 = vmatmul.mubr.bf16.vlgmr.msra.gmra.mrb[0].mxu1 %v832_v53 }
  0x69   :  { %466 = vmatprep.mubr.bf16.mxu1 %v836_v54 }
  0x70   :  { %467 = vmatmul.mubr.bf16.gmra.mrb[4].mxu1 %v839_v56 }
  0x71   :  { %476 = vmatprep.mubr.bf16.mxu1 %v840_v57 }
  0x78   :  { %477 = vmatmul.mubr.bf16.gmra.mrb[8].mxu1 %v843_v58 }
  0x79   :  { %486 = vmatprep.mubr.bf16.mxu1 %v844_v59 }
  0x80   :  { %487 = vmatmul.mubr.bf16.gmra.mrb[12].mxu1 %v847_v60 }
 0x11e   :  { %v531_v61 = vpop.f32.mrb[0].mxu0 }
 0x11f   :  { %v533_v62 = vpop.f32.mrb[1].mxu0 }
 0x120   :  { %v535_v63 = vpop.f32.mrb[2].mxu0 }
 0x121   :  { %v537_v0 = vpop.f32.mrb[3].mxu0 }
 0x126   :  { %v541_v2 = vpop.f32.mrb[4].mxu0 }
 0x127   :  { %v543_v3 = vpop.f32.mrb[5].mxu0 }
 0x128   :  { %v545_v5 = vpop.f32.mrb[6].mxu0 }
 0x129   :  { %v547_v6 = vpop.f32.mrb[7].mxu0 }
 0x12e   :  { %v551_v10 = vpop.f32.mrb[8].mxu0 }
 0x12f   :  { %v553_v11 = vpop.f32.mrb[9].mxu0 }
 0x130   :  { %v555_v13 = vpop.f32.mrb[10].mxu0 }
 0x131   :  { %v557_v15 = vpop.f32.mrb[11].mxu0 }
 0x136   :  { %v561_v24 = vpop.f32.mrb[12].mxu0 }
 0x137   :  { %v563_v27 = vpop.f32.mrb[13].mxu0 }
 0x138   :  { %v565_v29 = vpop.f32.mrb[14].mxu0 }
 0x139   :  { %v567_v32 = vpop.f32.mrb[15].mxu0 }
 0x13b   :  { %v458_v16 = vpop.f32.mrb[0].mxu1 }
 0x13c   :  { %v459_v17 = vadd.f32 %v458_v16, %v113_v12  ;;  %v460_v18 = vpop.f32.mrb[1].mxu1 }
 0x13d   :  { %v461_v19 = vadd.f32 %v460_v18, %v982_v14  ;;  %v462_v20 = vpop.f32.mrb[2].mxu1 }
 0x13e   :  { %v532_v21 = vadd.f32 %v531_v61, %v459_v17  ;;  %v463_v22 = vadd.f32 %v462_v20, %v113_v12  ;;  %v464_v23 = vpop.f32.mrb[3].mxu1 }
 0x13f   :  { %v534_v25 = vadd.f32 %v533_v62, %v461_v19  ;;  %v465_v26 = vadd.f32 %v464_v23, %v982_v14 }
 0x140   :  { %v536_v28 = vadd.f32 %v535_v63, %v463_v22 }
 0x141   :  { %v712_v30 = vpack.c.bf16 %v534_v25, %v532_v21  ;;  %v538_v31 = vadd.f32 %v537_v0, %v465_v26 }
 0x143   :  { %618 = vst [vmem:[#allocation7] sm:$0xff] %v712_v30  ;;  %v713_v33 = vpack.c.bf16 %v538_v31, %v536_v28  ;;  %v468_v34 = vpop.f32.mrb[4].mxu1 }
 0x144   :  { %v469_v35 = vadd.f32 %v468_v34, %v113_v12  ;;  %v470_v36 = vpop.f32.mrb[5].mxu1 }
 0x145   :  { %619 = vst [vmem:[#allocation7 + $0x8] sm:$0xff] %v713_v33  ;;  %v471_v37 = vadd.f32 %v470_v36, %v982_v14  ;;  %v472_v38 = vpop.f32.mrb[6].mxu1 }
 0x146   :  { %v542_v39 = vadd.f32 %v541_v2, %v469_v35  ;;  %v473_v40 = vadd.f32 %v472_v38, %v113_v12  ;;  %v474_v41 = vpop.f32.mrb[7].mxu1 }
 0x147   :  { %v544_v42 = vadd.f32 %v543_v3, %v471_v37  ;;  %v475_v43 = vadd.f32 %v474_v41, %v982_v14 }
 0x148   :  { %v546_v44 = vadd.f32 %v545_v5, %v473_v40 }
 0x149   :  { %v714_v45 = vpack.c.bf16 %v544_v42, %v542_v39  ;;  %v548_v46 = vadd.f32 %v547_v6, %v475_v43 }
 0x14b   :  { %620 = vst [vmem:[#allocation7 + $0x10] sm:$0xff] %v714_v45  ;;  %v715_v47 = vpack.c.bf16 %v548_v46, %v546_v44  ;;  %v478_v48 = vpop.f32.mrb[8].mxu1 }
 0x14c   :  { %v479_v49 = vadd.f32 %v478_v48, %v113_v12  ;;  %v480_v50 = vpop.f32.mrb[9].mxu1 }
 0x14d   :  { %621 = vst [vmem:[#allocation7 + $0x18] sm:$0xff] %v715_v47  ;;  %v481_v51 = vadd.f32 %v480_v50, %v982_v14  ;;  %v482_v52 = vpop.f32.mrb[10].mxu1 }
 0x14e   :  { %v552_v53 = vadd.f32 %v551_v10, %v479_v49  ;;  %v483_v54 = vadd.f32 %v482_v52, %v113_v12  ;;  %v484_v55 = vpop.f32.mrb[11].mxu1 }
 0x14f   :  { %v554_v56 = vadd.f32 %v553_v11, %v481_v51  ;;  %v485_v57 = vadd.f32 %v484_v55, %v982_v14 }
 0x150   :  { %v556_v58 = vadd.f32 %v555_v13, %v483_v54 }
 0x151   :  { %v716_v59 = vpack.c.bf16 %v554_v56, %v552_v53  ;;  %v558_v60 = vadd.f32 %v557_v15, %v485_v57 }
 0x153   :  { %622 = vst [vmem:[#allocation7 + $0x20] sm:$0xff] %v716_v59  ;;  %v717_v61 = vpack.c.bf16 %v558_v60, %v556_v58  ;;  %v488_v62 = vpop.f32.mrb[12].mxu1 }
 0x154   :  { %v489_v63 = vadd.f32 %v488_v62, %v113_v12  ;;  %v490_v0 = vpop.f32.mrb[13].mxu1 }
 0x155   :  { %623 = vst [vmem:[#allocation7 + $0x28] sm:$0xff] %v717_v61  ;;  %v491_v1 = vadd.f32 %v490_v0, %v982_v14  ;;  %v492_v2 = vpop.f32.mrb[14].mxu1 }
 0x156   :  { %v562_v3 = vadd.f32 %v561_v24, %v489_v63  ;;  %v493_v4 = vadd.f32 %v492_v2, %v113_v12  ;;  %v494_v5 = vpop.f32.mrb[15].mxu1 }
 0x157   :  { %v564_v6 = vadd.f32 %v563_v27, %v491_v1  ;;  %v495_v7 = vadd.f32 %v494_v5, %v982_v14 }
 0x158   :  { %v566_v8 = vadd.f32 %v565_v29, %v493_v4 }
 0x159   :  { %v718_v9 = vpack.c.bf16 %v564_v6, %v562_v3  ;;  %v568_v10 = vadd.f32 %v567_v32, %v495_v7 }
 0x15b   :  { %624 = vst [vmem:[#allocation7 + $0x30] sm:$0xff] %v718_v9  ;;  %v719_v11 = vpack.c.bf16 %v568_v10, %v566_v8 }
 0x15d   :  { %625 = vst [vmem:[#allocation7 + $0x38] sm:$0xff] %v719_v11 }
 0x15e   :  { %903 = shalt.err (!%p900_p6)
}
 0x15f   :  { %s904_s17 = scalar_lea.hbm %s1010_s3, 1024 }
 0x160   :  { %p905_p7 = scmp.ne.s32.totalorder %s1010_s3, %s904_s17  ;;  %p908_p8 = scmp.lt.u32.totalorder %s904_s17, %s1010_s3 }
 0x162   :  { %p910_p9 = pnand %p908_p8, %p905_p7 }
 0x164   :  { %913 = shalt.err (!%p910_p9)
}
 0x165   :  { %637 = dma.vmem_to_hbm [thread:$0]  %s632_s13, 1024, %s1010_s3, [#allocation4], %s924_s0, %s924_s0, %s925_s9  }
 0x166   :  { %918 = dma.done.wait [#allocation4], 1024  }
 0x167   :  { %919 = vsyncadd [#allocation4], 4294966272 }
 0x168   :  { %641 = vsyncpa [#allocation3], 1 }
 0x169   :  { %642 = vsyncpa [#allocation6], 1 }
 0x16a   :  { %643 = vsyncpa [#allocation4], 1 }

</bundles_post_ra>
